<compile_context>
chip_gen: v5e
topology: v5e:2x2
jax: 0.10.0
libtpu: 0.0.40
codegen_flags: <defaults>
</compile_context>

<pallas_src>
import functools

import jax
import jax.numpy as jnp
from jax.experimental import pallas as pl
from jax.experimental.pallas import tpu as pltpu


_VMEM_LIMIT_BYTES = 48 * 1024 * 1024     # <= v7x 64 MiB physical; >> default need
_TARGET_BLOCK_BYTES = 4 * 1024 * 1024    # ~4 MiB x-block -> ~16-20 MiB in flight


# ---------------------------------------------------------------------------
# Block-size selection
# ---------------------------------------------------------------------------
def _pick_blocks(B, T, C, itemsize,
                 target_bytes=_TARGET_BLOCK_BYTES, min_steps=2):
    """Choose (batch_block bb, channel_block tc).

    Prefers full-C blocks (contiguous HBM DMA) and amortizes grid steps along
    the batch axis; keeps >= `min_steps` grid steps so both v7x TensorCores get
    work.  C is split (at 128-multiples) only when one (1, T, C) row alone
    exceeds the target block size.
    """
    row_bytes = T * C * itemsize
    if row_bytes <= target_bytes:
        tc = C
        bb = max(1, min(B, target_bytes // row_bytes))
        while B % bb:
            bb -= 1
        while bb > 1 and (B // bb) < min_steps:   # keep >=2 parallel steps
            bb -= 1
            while B % bb:
                bb -= 1
    else:
        bb = 1
        if C % 128 == 0:
            tc = 128
            while (tc * 2 <= C and C % (tc * 2) == 0
                   and T * (tc * 2) * itemsize <= target_bytes):
                tc *= 2
        else:
            tc = C   # full extent is always a legal last-dim block size
    return bb, tc


# ---------------------------------------------------------------------------
# Kernels
# ---------------------------------------------------------------------------
def _revin_norm_kernel(x_ref, w_ref, b_ref, y_ref, stats_ref, *, eps, affine):
    x = x_ref[...].astype(jnp.float32)                 # (bb, T, tc)
    inv_t = 1.0 / x.shape[1]
    # One sweep over the block: sum(x) and sum(x*x); var = E[x^2] - mu^2.
    s1 = jnp.sum(x, axis=1, keepdims=True)             # (bb, 1, tc)
    s2 = jnp.sum(x * x, axis=1, keepdims=True)
    mu = s1 * inv_t
    var = jnp.maximum(s2 * inv_t - mu * mu, 0.0)       # clamp tiny negatives
    std = jnp.sqrt(var + eps)
    inv_std = 1.0 / std                                # divide on (bb,1,tc) only
    if affine:
        scale = inv_std * w_ref[0, 0]                  # scalar affine from SMEM
        shift = b_ref[0, 0] - mu * scale
    else:
        scale = inv_std
        shift = -mu * scale
    # Single fused multiply-add per element.
    y_ref[...] = (x * scale + shift).astype(y_ref.dtype)
    # Packed stats output: row 0 = mean, row 1 = stdev.
    stats_ref[...] = jnp.concatenate([mu, std], axis=1)


def _revin_denorm_kernel(x_ref, stats_ref, w_ref, b_ref, y_ref, *, eps, affine):
    x = x_ref[...].astype(jnp.float32)                 # (bb, T, tc)
    mu = stats_ref[:, 0:1, :]                          # (bb, 1, tc) f32
    std = stats_ref[:, 1:2, :]
    if affine:
        inv_w = 1.0 / (w_ref[0, 0] + eps * eps)        # scalar reciprocal
        scale = std * inv_w
        shift = mu - b_ref[0, 0] * scale
    else:
        scale = std
        shift = mu
    y_ref[...] = (x * scale + shift).astype(y_ref.dtype)


# ---------------------------------------------------------------------------
# Wrappers
# ---------------------------------------------------------------------------
def revin_norm(x, weight, bias, *, eps=1e-5, affine=True):
    """x: (B, T, C) -> (y (B,T,C), stats (B,2,C) f32 packed [mean; stdev])."""
    B, T, C = x.shape
    itemsize = jnp.dtype(x.dtype).itemsize
    bb, tc = _pick_blocks(B, T, C, itemsize)
    grid = (B // bb, C // tc)

    smem = pl.BlockSpec(memory_space=pltpu.MemorySpace.SMEM)
    kernel = functools.partial(_revin_norm_kernel, eps=eps, affine=affine)
    cost = pl.CostEstimate(
        flops=8 * B * T * C,
        transcendentals=B * C,
        bytes_accessed=2 * B * T * C * itemsize + 2 * B * C * 4,
    )

    return pl.pallas_call(
        kernel,
        out_shape=[
            jax.ShapeDtypeStruct((B, T, C), x.dtype),
            jax.ShapeDtypeStruct((B, 2, C), jnp.float32),   # packed mean/stdev
        ],
        grid_spec=pltpu.PrefetchScalarGridSpec(
            num_scalar_prefetch=0,
            grid=grid,
            in_specs=[
                pl.BlockSpec((bb, T, tc), lambda b, c: (b, 0, c)),  # x
                smem,                                               # weight
                smem,                                               # bias
            ],
            out_specs=[
                pl.BlockSpec((bb, T, tc), lambda b, c: (b, 0, c)),  # y
                pl.BlockSpec((bb, 2, tc), lambda b, c: (b, 0, c)),  # stats
            ],
        ),
        compiler_params=pltpu.CompilerParams(
            dimension_semantics=("parallel", "parallel"),
            vmem_limit_bytes=_VMEM_LIMIT_BYTES,
        ),
        cost_estimate=cost,
    )(x, weight, bias)


def revin_denorm(x, stats, weight, bias, *, eps=1e-5, affine=True):
    """Inverse transform using packed stats (B,2,C) produced by revin_norm."""
    B, T, C = x.shape
    itemsize = jnp.dtype(x.dtype).itemsize
    bb, tc = _pick_blocks(B, T, C, itemsize)
    grid = (B // bb, C // tc)

    smem = pl.BlockSpec(memory_space=pltpu.MemorySpace.SMEM)
    kernel = functools.partial(_revin_denorm_kernel, eps=eps, affine=affine)
    cost = pl.CostEstimate(
        flops=2 * B * T * C,
        transcendentals=0,
        bytes_accessed=2 * B * T * C * itemsize + 2 * B * C * 4,
    )

    return pl.pallas_call(
        kernel,
        out_shape=jax.ShapeDtypeStruct((B, T, C), x.dtype),
        grid_spec=pltpu.PrefetchScalarGridSpec(
            num_scalar_prefetch=0,
            grid=grid,
            in_specs=[
                pl.BlockSpec((bb, T, tc), lambda b, c: (b, 0, c)),  # x
                pl.BlockSpec((bb, 2, tc), lambda b, c: (b, 0, c)),  # stats
                smem,                                               # weight
                smem,                                               # bias
            ],
            out_specs=pl.BlockSpec((bb, T, tc), lambda b, c: (b, 0, c)),
        ),
        compiler_params=pltpu.CompilerParams(
            dimension_semantics=("parallel", "parallel"),
            vmem_limit_bytes=_VMEM_LIMIT_BYTES,
        ),
        cost_estimate=cost,
    )(x, stats, weight, bias)


class RevINPallas:
    """Python wrapper mirroring the stateful PyTorch RevIN forward."""

    def __init__(self, eps=1e-5, affine=True, subtract_last=False):
        if subtract_last:
            # TODO(synk): subtract_last=True path (use x[:, -1] instead of the mean).
            raise NotImplementedError("subtract_last not implemented")
        self.eps = eps
        self.affine = affine
        self.affine_weight = jnp.ones((1, 1), jnp.float32)   # nn.Parameter(torch.ones(1))
        self.affine_bias = jnp.zeros((1, 1), jnp.float32)    # nn.Parameter(torch.zeros(1))
        self.stats = None          # packed (B, 2, C)
        self.mean = None
        self.stdev = None

    def __call__(self, x, mode: str):
        if mode == "norm":
            y, stats = revin_norm(
                x, self.affine_weight, self.affine_bias,
                eps=self.eps, affine=self.affine)
            self.stats = stats
            self.mean = stats[:, 0:1, :]
            self.stdev = stats[:, 1:2, :]
            return y
        elif mode == "denorm":
            return revin_denorm(
                x, self.stats, self.affine_weight, self.affine_bias,
                eps=self.eps, affine=self.affine)
        raise NotImplementedError


# ---------------------------------------------------------------------------
# Test
# ---------------------------------------------------------------------------
def _run_case(key, B, T, C, eps, affine, w_val, b_val):
    x = 2.0 * jax.random.normal(key, (B, T, C), dtype=jnp.float32) + 0.5

    model = RevINPallas(eps=eps, affine=affine)
    model.affine_weight = jnp.full((1, 1), w_val, jnp.float32)
    model.affine_bias = jnp.full((1, 1), b_val, jnp.float32)

    y = jax.block_until_ready(model(x, "norm"))
    x_rec = jax.block_until_ready(model(y, "denorm"))

    # Pure-JAX reference mirroring the PyTorch module.
    mean_ref = jnp.mean(x, axis=1, keepdims=True)
    std_ref = jnp.sqrt(jnp.var(x, axis=1, keepdims=True) + eps)  # unbiased=False
    y_ref = (x - mean_ref) / std_ref
    if affine:
        y_ref = y_ref * w_val + b_val
    x_rec_ref = y_ref
    if affine:
        x_rec_ref = (x_rec_ref - b_val) / (w_val + eps * eps)
    x_rec_ref = x_rec_ref * std_ref + mean_ref

    assert jnp.allclose(y, y_ref, rtol=1e-5, atol=1e-5), "norm output mismatch"
    assert jnp.allclose(model.mean, mean_ref, rtol=1e-5, atol=1e-5), "mean mismatch"
    assert jnp.allclose(model.stdev, std_ref, rtol=1e-5, atol=1e-5), "stdev mismatch"
    assert jnp.allclose(x_rec, x_rec_ref, rtol=1e-5, atol=1e-5), "denorm output mismatch"
    assert jnp.allclose(x_rec, x, rtol=1e-3, atol=1e-3), "roundtrip mismatch"


if __name__ == "__main__":
    eps = 1e-5
    k0, k1 = jax.random.split(jax.random.PRNGKey(0))
    # Small-C case (typical time-series feature count), affine path.
    _run_case(k0, B=2, T=8, C=16, eps=eps, affine=True, w_val=1.3, b_val=-0.2)
    # Lane-dense / multi-batch-block case, non-affine path.
    _run_case(k1, B=4, T=16, C=128, eps=eps, affine=False, w_val=1.0, b_val=0.0)
    print("KERNEL_OK")
</pallas_src>

<mosaic_0001>
module attributes {stable_mosaic.version = 11 : i64} {
  func.func @_revin_norm_kernel(%arg0: i32, %arg1: i32, %arg2: memref<1x8x16xf32, #tpu.memory_space<vmem>>, %arg3: memref<1x1xf32, #tpu.memory_space<smem>>, %arg4: memref<1x1xf32, #tpu.memory_space<smem>>, %arg5: memref<1x8x16xf32, #tpu.memory_space<vmem>>, %arg6: memref<1x2x16xf32, #tpu.memory_space<vmem>>) attributes {dimension_semantics = [#tpu.dimension_semantics<parallel>, #tpu.dimension_semantics<parallel>], iteration_bounds = array<i64: 2, 1>, scalar_prefetch = 0 : i64, scratch_operands = 0 : i64, tpu.core_type = #tpu.core_type<tc>, window_params = [{transform_indices = @transform_0, window_bounds = array<i64: 1, 8, 16>}, {transform_indices = @transform_1, window_bounds = array<i64: 1, 1>}, {transform_indices = @transform_2, window_bounds = array<i64: 1, 1>}, {transform_indices = @transform_3, window_bounds = array<i64: 1, 8, 16>}, {transform_indices = @transform_4, window_bounds = array<i64: 1, 2, 16>}]} {
    %c0 = arith.constant 0 : index
    %c0_0 = arith.constant 0 : index
    %c0_1 = arith.constant 0 : index
    %0 = vector.load %arg2[%c0, %c0_0, %c0_1] : memref<1x8x16xf32, #tpu.memory_space<vmem>>, vector<1x8x16xf32>
    %cst = arith.constant dense<0.000000e+00> : vector<1x16xf32>
    %1 = vector.multi_reduction <add>, %0, %cst [1] : vector<1x8x16xf32> to vector<1x16xf32>
    %2 = vector.shape_cast %1 : vector<1x16xf32> to vector<1x1x16xf32>
    %3 = arith.mulf %0, %0 : vector<1x8x16xf32>
    %cst_2 = arith.constant dense<0.000000e+00> : vector<1x16xf32>
    %4 = vector.multi_reduction <add>, %3, %cst_2 [1] : vector<1x8x16xf32> to vector<1x16xf32>
    %5 = vector.shape_cast %4 : vector<1x16xf32> to vector<1x1x16xf32>
    %cst_3 = arith.constant 1.250000e-01 : f32
    %6 = vector.broadcast %cst_3 : f32 to vector<1x1x16xf32>
    %7 = arith.mulf %2, %6 : vector<1x1x16xf32>
    %cst_4 = arith.constant 1.250000e-01 : f32
    %8 = vector.broadcast %cst_4 : f32 to vector<1x1x16xf32>
    %9 = arith.mulf %5, %8 : vector<1x1x16xf32>
    %10 = arith.mulf %7, %7 : vector<1x1x16xf32>
    %11 = arith.subf %9, %10 : vector<1x1x16xf32>
    %cst_5 = arith.constant 0.000000e+00 : f32
    %12 = vector.broadcast %cst_5 : f32 to vector<1x1x16xf32>
    %13 = arith.maximumf %11, %12 : vector<1x1x16xf32>
    %cst_6 = arith.constant 9.99999974E-6 : f32
    %14 = vector.broadcast %cst_6 : f32 to vector<1x1x16xf32>
    %15 = arith.addf %13, %14 : vector<1x1x16xf32>
    %16 = math.sqrt %15 : vector<1x1x16xf32>
    %cst_7 = arith.constant 1.000000e+00 : f32
    %17 = vector.broadcast %cst_7 : f32 to vector<1x1x16xf32>
    %18 = arith.divf %17, %16 : vector<1x1x16xf32>
    %c0_8 = arith.constant 0 : index
    %c0_9 = arith.constant 0 : index
    %19 = memref.load %arg3[%c0_8, %c0_9] : memref<1x1xf32, #tpu.memory_space<smem>>
    %20 = vector.broadcast %19 : f32 to vector<1x1x16xf32>
    %21 = arith.mulf %18, %20 : vector<1x1x16xf32>
    %c0_10 = arith.constant 0 : index
    %c0_11 = arith.constant 0 : index
    %22 = memref.load %arg4[%c0_10, %c0_11] : memref<1x1xf32, #tpu.memory_space<smem>>
    %23 = arith.mulf %7, %21 : vector<1x1x16xf32>
    %24 = vector.broadcast %22 : f32 to vector<1x1x16xf32>
    %25 = arith.subf %24, %23 : vector<1x1x16xf32>
    %26 = vector.broadcast %21 : vector<1x1x16xf32> to vector<1x8x16xf32>
    %27 = arith.mulf %0, %26 : vector<1x8x16xf32>
    %28 = vector.broadcast %25 : vector<1x1x16xf32> to vector<1x8x16xf32>
    %29 = arith.addf %27, %28 : vector<1x8x16xf32>
    %c0_12 = arith.constant 0 : index
    %c0_13 = arith.constant 0 : index
    %c0_14 = arith.constant 0 : index
    %30 = vector.load %arg5[%c0_12, %c0_13, %c0_14] : memref<1x8x16xf32, #tpu.memory_space<vmem>>, vector<1x8x16xf32>
    tpu.vector_store %arg5[%c0_12, %c0_13, %c0_14], %29 {strides = array<i32>} : memref<1x8x16xf32, #tpu.memory_space<vmem>>, vector<1x8x16xf32>,
    %31 = tpu.concatenate %7, %16 in 1 : vector<1x1x16xf32>, vector<1x1x16xf32> -> vector<1x2x16xf32>
    %c0_15 = arith.constant 0 : index
    %c0_16 = arith.constant 0 : index
    %c0_17 = arith.constant 0 : index
    %32 = vector.load %arg6[%c0_15, %c0_16, %c0_17] : memref<1x2x16xf32, #tpu.memory_space<vmem>>, vector<1x2x16xf32>
    tpu.vector_store %arg6[%c0_15, %c0_16, %c0_17], %31 {strides = array<i32>} : memref<1x2x16xf32, #tpu.memory_space<vmem>>, vector<1x2x16xf32>,
    return
  }
  func.func @transform_0(%arg0: i32, %arg1: i32) -> (i32, i32, i32) {
    %c0_i32 = arith.constant 0 : i32
    %c0_i32_0 = arith.constant 0 : i32
    return %arg0, %c0_i32, %arg1 : i32, i32, i32
  }
  func.func @transform_1(%arg0: i32, %arg1: i32) -> (i32, i32) {
    %c0_i32 = arith.constant 0 : i32
    %c0_i32_0 = arith.constant 0 : i32
    %c0_i32_1 = arith.constant 0 : i32
    return %c0_i32, %c0_i32_0 : i32, i32
  }
  func.func @transform_2(%arg0: i32, %arg1: i32) -> (i32, i32) {
    %c0_i32 = arith.constant 0 : i32
    %c0_i32_0 = arith.constant 0 : i32
    %c0_i32_1 = arith.constant 0 : i32
    return %c0_i32, %c0_i32_0 : i32, i32
  }
  func.func @transform_3(%arg0: i32, %arg1: i32) -> (i32, i32, i32) {
    %c0_i32 = arith.constant 0 : i32
    %c0_i32_0 = arith.constant 0 : i32
    return %arg0, %c0_i32, %arg1 : i32, i32, i32
  }
  func.func @transform_4(%arg0: i32, %arg1: i32) -> (i32, i32, i32) {
    %c0_i32 = arith.constant 0 : i32
    %c0_i32_0 = arith.constant 0 : i32
    return %arg0, %c0_i32, %arg1 : i32, i32, i32
  }
}

</mosaic_0001>

<bundles_post_ra>
// kernel: tpu_custom_call.1
= control target key start
LH: loop header
LB: loop body
LE: loop exit
PB: predicated region body
PF: predicated region fallthrough
CT: control target
= control target key end

     0   :  { %s881_s0 = inlined_call_operand.hbm [shape: f32[2,8,16], index: 0, kind: input, shape index: {}]   ;;  %s882_s1 = inlined_call_operand.<no memory space> [shape: f32[1,1], index: 1, kind: input, shape index: {}]   ;;  %s883_s2 = inlined_call_operand.<no memory space> [shape: f32[1,1], index: 2, kind: input, shape index: {}]   ;;  %s884_s3 = inlined_call_operand.hbm [shape: f32[2,8,16], index: 3, kind: output, shape index: {0}]   ;;  %s885_s4 = inlined_call_operand.hbm [shape: f32[2,2,16], index: 4, kind: output, shape index: {1}]  }
   0x1   :  { %10 = sst [smem:[#allocation2]] %s882_s1 }
   0x2   :  { %11 = sst [smem:[#allocation3]] %s883_s2 }
   0x3   :  { %12 = vsyncpa [#allocation5], 0 }
   0x4   :  { %14 = vsyncpa [#allocation5 + $0x1], 0 }
   0x5   :  { %15 = vsyncpa [#allocation6], 0 }
   0x6   :  { %17 = vsyncpa [#allocation6 + $0x1], 0 }
   0x7   :  { %18 = vsyncpa [#allocation9], 0 }
   0x8   :  { %20 = vsyncpa [#allocation9 + $0x1], 0  ;;  %s726_s19 = smov 0   ;;  %s728_s20 = smov 0  }
   0x9   :  { %s730_s21 = smov 0   ;;  %s732_s22 = smov 0  }
   0xa   :  { %s734_s23 = smov 0   ;;  %s736_s1 = smov 0  }
   0xb LB: > { %s462_s2 = sadd.s32 4294967295, %s693_s1   ;;  %s463_s24 = sadd.s32 4294967294, %s693_s1   ;;  %s693_s1 = sphi %s736_s1, %s26_s1   ;;  %s689_s23 = sphi %s734_s23, %s894_s23   ;;  %s685_s22 = sphi %s732_s22, %s893_s22   ;;  %s681_s21 = sphi %s730_s21, %s892_s21   ;;  %s677_s20 = sphi %s728_s20, %s891_s20   ;;  %s673_s19 = sphi %s726_s19, %s890_s19  }
   0xc   : > { %s38_s25 = sadd.s32 1, %s689_s23  ;;  %s47_s26 = sadd.s32 1, %s681_s21 }
   0xd   : > { %p40_p0 = scmp.ge.s32.totalorder %s38_s25, 2  ;;  %p54_p1 = scmp.ne.s32.totalorder %s681_s21, %s677_s20 }
   0xe   : > { %p55_p2 = scmp.eq.s32.totalorder %s693_s1, 0  ;;  %p60_p3 = scmp.ne.s32.totalorder %s677_s20, %s673_s19 }
   0xf   : > { %s896_s25 = smov (%p40_p0, %s38_s25), 0  ;;  %p61_p5 = scmp.eq.s32.totalorder %s462_s2, 0 }
  0x10   : > { %p767_p4 = por %p55_p2, %p54_p1  ;;  %s42_s28 = ssub.s32 %s689_s23, %s896_s25 }
  0x11   : > { %p128_p6 = scmp.eq.s32.totalorder %s462_s2, 1  ;;  %p45_p7 = scmp.eq.s32.totalorder %s42_s28, 0 }
  0x12   : > { %p773_p8 = por %p61_p5, %p60_p3  ;;  %p134_p10 = scmp.eq.s32.totalorder %s463_s24, 1 }
  0x13   : > { %p777_p9 = por %p128_p6, %p54_p1  ;;  %p465_p12 = scmp.ge.s32.totalorder %s693_s1, 2 }
  0x14   : > { %s782_s5 = scalar_select %p45_p7, %s681_s21, %s47_s26  }
  0x15   : > { %p784_p11 = por %p134_p10, %p60_p3  ;;  %p495_p13 = scmp.lt.s32.totalorder %s693_s1, 2 }
  0x16   : > { %s188_s7 = sand.u32 1, %s681_s21   ;;  %s467_s9 = sshll.u32 %s689_s23, 3 }
  0x17   : > { %s466_s8 = sshll.u32 %s188_s7, 3  ;;  %s197_s12 = scalar_lea.hbm %s881_s0, %s467_s9 }
  0x18   : > { %s192_s13 = scalar_lea.vmem [#allocation4], %s466_s8  ;;  %s199_s15 = sshll.u32 %s197_s12, 4  ;;  %s200_s15 = int_to_ptr.hbm [resolvable:$true] %s199_s15 }
  0x19   : > { %s201_s14 = sshll.u32 %s192_s13, 4  ;;  %p485_p0 = pnand %p495_p13, %p767_p4  ;;  %s202_s14 = int_to_ptr.vmem [resolvable:$true] %s201_s14 }
  0x1a   : > { %p468_p1 = scmp.ge.s32.totalorder %s693_s1, 1  ;;  %p206_p2 = scmp.lt.s32.totalorder %s693_s1, 3 }
  0x1b   : > { %s189_s16 = scalar_lea.sflag [#allocation5], %s188_s7 }
  0x1c   : > { %487 = dma.hbm_to_vmem [thread:$0]  (!%p485_p0), %s200_s15, 128, %s202_s14, %s189_s16  }
  0x1d   : > { %p207_p3 = pnand %p468_p1, %p206_p2 }
  0x1e   : > { %s800_s17 = sand.u32 (!%p207_p3), 1, %s677_s20  }
  0x1f   : > { %210 = sbr.rel (%p207_p3) target bundleno = 110 (0x6e), region = 32  ;;  %s469_s18 = sshll.u32 (!%p207_p3), %s800_s17, 3 }
  0x20   : > { %s213_s2 = scalar_lea.sflag (!%p207_p3), [#allocation5], %s800_s17  ;;  %s216_s24 = scalar_lea.vmem (!%p207_p3), [#allocation4], %s469_s18 }
  0x24   : > { %660 = dma.done.wait (%p773_p8), %s213_s2, 128  }
  0x25   : > { %662 = vsyncadd (%p773_p8), %s213_s2, 4294967168  ;;  %vm248_vm0 = vcmask 130048   ;;  %v810_v0 = vld [vmem:[%s216_s24] sm:$0xff]  ;;  %s471_s26 = sshll.u32 %s800_s17, 1  ;;  %s475_s27 = sshll.u32 %s685_s22, 1  ;;  %vm307_vm3 = vcmask 1040384  }
  0x26   : > { %v249_v1 = vsel %vm248_vm0, %v810_v0, 0.0  ;;  %v256_v2 = vmul.f32 %v810_v0, %v810_v0  ;;  %s343_s7 = scalar_lea.hbm %s885_s4, %s475_s27  ;;  %s246_s8 = scalar_lea.vmem [#allocation8], %s471_s26  ;;  %vm309_vm4 = vcmask 123904  }
  0x27   : > { %v250_v3 = vrot.slane %v249_v1, 4  ;;  %s345_s9 = sshll.u32 %s246_s8, 4  ;;  %s347_s10 = sshll.u32 %s343_s7, 4  ;;  %s346_s9 = int_to_ptr.vmem [resolvable:$true] %s345_s9  ;;  %s348_s10 = int_to_ptr.hbm [resolvable:$true] %s347_s10 }
  0x28   : > { %v257_v4 = vsel %vm248_vm0, %v256_v2, 0.0  ;;  %s317_s11 = scalar_lea.sflag [#allocation9], %s800_s17  ;;  %s593_s12 = sshra.s32 %s348_s10, 4  ;;  %s594_s12 = int_to_ptr.hbm [resolvable:$true] %s593_s12 }
  0x29   : > { %v251_v5 = vadd.f32 %v250_v3, %v249_v1  ;;  %v258_v6 = vrot.slane %v257_v4, 4  ;;  %s595_s13 = scalar_lea.hbm %s594_s12, 2  ;;  %s599_s16 = scalar_lea.hbm %s885_s4, 4 }
  0x2a   : > { %p596_p4 = scmp.ne.s32.totalorder %s594_s12, %s595_s13  ;;  %p600_p7 = scmp.lt.s32.totalorder %s594_s12, %s885_s4 }
  0x2b   : > { %v252_v7 = vrot.slane %v251_v5, 2  ;;  %v259_v8 = vadd.f32 %v258_v6, %v257_v4  ;;  %p601_p8 = scmp.lt.s32.totalorder %s599_s16, %s595_s13 }
  0x2c   : > { %p597_p5 = pnand %p596_p4, %p777_p9 }
  0x2d   : > { %v253_v9 = vadd.f32 %v252_v7, %v251_v5  ;;  %v260_v10 = vrot.slane %v259_v8, 2  ;;  %p602_p10 = por %p601_p8, %p600_p7 }
  0x2e   : > { %p598_p6 = pneg %p597_p5 }
  0x2f   : > { %v254_v11 = vrot.slane %v253_v9, 1  ;;  %v261_v12 = vadd.f32 %v260_v10, %v259_v8 }
  0x30   : > { %p603_p13 = pnand %p602_p10, %p598_p6 }
  0x31   : > { %v255_v13 = vadd.f32 %v254_v11, %v253_v9  ;;  %v262_v14 = vrot.slane %v261_v12, 1 }
  0x33   : > { %v263_v15 = vadd.f32 %v262_v14, %v261_v12  ;;  %v817_v16 = vmul.f32 0.125, %v255_v13 }
  0x35   : > { %v265_v17 = vmul.f32 0.125, %v263_v15  ;;  %v266_v18 = vmul.f32 %v817_v16, %v817_v16 }
  0x37   : > { %v267_v19 = vsub.f32 %v265_v17, %v266_v18 }
  0x39   : > { %v268_v20 = vmax.f32 %v267_v19, 0.0 }
  0x3b   : > { %v269_v21 = vadd.f32 1e-05, %v268_v20 }
  0x3d   : > { %545 = vrsqrt.f32 %v269_v21  ;;  %vm277_vm1 = vcmp.eq.f32.partialorder %v269_v21, inf  ;;  %v280_v28 = vand.u32 2147483648, %v269_v21  ;;  %vm279_vm2 = vcmp.eq.f32.partialorder %v269_v21, 0.0 }
  0x43   : > { %v546_v22 = vpop.eup %545 }
  0x44   : > { %v271_v23 = vmul.f32 %v546_v22, %v269_v21 }
  0x46   : > { %v272_v24 = vmul.f32 %v546_v22, %v271_v23 }
  0x48   : > { %v273_v25 = vmul.f32 0.5, %v272_v24 }
  0x4a   : > { %v274_v26 = vsub.f32 1.5, %v273_v25 }
  0x4c   : > { %v275_v27 = vmul.f32 %v546_v22, %v274_v26 }
  0x4e   : > { %v276_v29 = vmul.f32 %v275_v27, %v269_v21 }
  0x50   : > { %v278_v30 = vsel %vm277_vm1, %v269_v21, %v276_v29 }
  0x51   : > { %v281_v31 = vsel %vm279_vm2, %v280_v28, %v278_v30 }
  0x52   : > { %547 = vrcp.f32 %v281_v31  ;;  %v308_v32 = vsel %vm307_vm3, %v817_v16, %v281_v31 }
  0x53   : > { %310 = vst.msk [vmem:[%s246_s8] sm:$0x3] %vm309_vm4, %v308_v32 }
  0x54   : > { %606 = shalt.err (!%p603_p13)
}
  0x55   : > { %481 = dma.vmem_to_hbm [thread:$0]  (%p777_p9), %s346_s9, 32, %s348_s10, %s317_s11   ;;  %v293_v35 = vand.u32 2147483648, %v281_v31  ;;  %vm287_vm5 = vweird.f32 %v281_v31  ;;  %v291_v37 = vand.u32 2147483647, %v281_v31 }
  0x56   : > { %s297_s26 = sld [smem:[#allocation2]]  ;;  %s474_s28 = sshll.u32 %s685_s22, 3 }
  0x57   : > { %s300_s27 = sld [smem:[#allocation3]]  ;;  %v294_v39 = vor.u32 1.1754944e-38, %v293_v35  ;;  %vm292_vm8 = vcmp.eq.f32.partialorder %v291_v37, 8.507059e+37  ;;  %s328_s8 = scalar_lea.hbm %s884_s3, %s474_s28 }
  0x58   : > { %v548_v33 = vpop.eup %547  ;;  %s239_s9 = scalar_lea.vmem [#allocation7], %s469_s18  ;;  %s332_s11 = sshll.u32 %s328_s8, 4  ;;  %s333_s11 = int_to_ptr.hbm [resolvable:$true] %s332_s11 }
  0x59   : > { %v283_v34 = vmul.f32 %v548_v33, %v281_v31  ;;  %vm288_vm6 = vweird.f32 %v548_v33  ;;  %s330_s10 = sshll.u32 %s239_s9, 4  ;;  %s312_s22 = scalar_lea.sflag [#allocation6], %s800_s17  ;;  %s331_s10 = int_to_ptr.vmem [resolvable:$true] %s330_s10 }
  0x5a   : > { %vm289_vm7 = vmor %vm287_vm5, %vm288_vm6  ;;  %s621_s12 = sshra.s32 %s333_s11, 4  ;;  %s627_s18 = scalar_lea.hbm %s884_s3, 16  ;;  %s622_s12 = int_to_ptr.hbm [resolvable:$true] %s621_s12 }
  0x5b   : > { %v284_v36 = vsub.f32 1.0, %v283_v34  ;;  %s623_s13 = scalar_lea.hbm %s622_s12, 8  ;;  %p628_p3 = scmp.lt.s32.totalorder %s622_s12, %s884_s3 }
  0x5c   : > { %v298_v41 = vstv %s297_s26  ;;  %p624_p0 = scmp.ne.s32.totalorder %s622_s12, %s623_s13  ;;  %p629_p4 = scmp.lt.s32.totalorder %s627_s18, %s623_s13 }
  0x5d   : > { %v285_v38 = vmul.f32 %v548_v33, %v284_v36  ;;  %v302_v45 = vstv %s300_s27 }
  0x5e   : > { %p625_p1 = pnand %p624_p0, %p777_p9  ;;  %p630_p5 = por %p629_p4, %p628_p3 }
  0x5f   : > { %v286_v40 = vadd.f32 %v548_v33, %v285_v38 }
  0x60   : > { %p626_p2 = pneg %p625_p1 }
  0x61   : > { %v290_v42 = vsel %vm289_vm7, %v548_v33, %v286_v40 }
  0x62   : > { %v295_v43 = vsel %vm292_vm8, %v294_v39, %v290_v42  ;;  %p631_p6 = pnand %p630_p5, %p626_p2 }
  0x63   : > { %v299_v44 = vmul.f32 %v298_v41, %v295_v43 }
  0x65   : > { %v301_v46 = vmul.f32 %v299_v44, %v817_v16  ;;  %v304_v47 = vmul.f32 %v299_v44, %v810_v0 }
  0x67   : > { %v303_v48 = vsub.f32 %v302_v45, %v301_v46 }
  0x69   : > { %v305_v49 = vadd.f32 %v304_v47, %v303_v48 }
  0x6b   : > { %306 = vst.msk [vmem:[%s239_s9] sm:$0xff] %vm248_vm0, %v305_v49 }
  0x6c   : > { %634 = shalt.err (!%p631_p6)
}
  0x6d   : > { %480 = dma.vmem_to_hbm [thread:$0]  (%p777_p9), %s331_s10, 128, %s333_s11, %s312_s22  }
  0x6e PF: > { %s359_s17 = sand.u32 1, %s673_s19   ;;  %p489_p7 = pnand %p465_p12, %p784_p11 }
  0x6f   : > { %s360_s24 = scalar_lea.sflag [#allocation6], %s359_s17 }
  0x70   : > { %p490_p8 = pneg %p489_p7 }
  0x72   : > { %664 = dma.done.wait (%p490_p8), %s360_s24, 128  }
  0x73   : > { %666 = vsyncadd (%p490_p8), %s360_s24, 4294967168  ;;  %s370_s26 = scalar_lea.sflag [#allocation9], %s359_s17 }
  0x74   : > { %668 = dma.done.wait (%p490_p8), %s370_s26, 32  }
  0x75   : > { %670 = vsyncadd (%p490_p8), %s370_s26, 4294967264  ;;  %s26_s1 = sadd.s32 1, %s693_s1   ;;  %s890_s19 = smov %s677_s20 }
  0x76   : > { %p23_p10 = scmp.ge.s32.totalorder %s26_s1, 4   ;;  %s891_s20 = smov %s681_s21 }
  0x77   : > { %s892_s21 = smov %s782_s5  ;;  %s893_s22 = smov %s689_s23 }
  0x78   : > { %s894_s23 = smov %s896_s25  ;;  %25 = sbr.rel (!%p23_p10) target bundleno = 11 (0xb), region = 94 }
  0x7d   :  { %376 = vsyncpa [#allocation5], 1 }
  0x7e   :  { %378 = vsyncpa [#allocation5 + $0x1], 1 }
  0x7f   :  { %379 = vsyncpa [#allocation6], 1 }
  0x80   :  { %381 = vsyncpa [#allocation6 + $0x1], 1 }
  0x81   :  { %382 = vsyncpa [#allocation9], 1 }
  0x82   :  { %384 = vsyncpa [#allocation9 + $0x1], 1 }

</bundles_post_ra>
